<compile_context>
chip_gen: v5e
topology: v5e:2x2
jax: 0.10.0
libtpu: 0.0.40
codegen_flags: <defaults>
</compile_context>

<pallas_src>
import functools

import numpy as np

import jax
import jax.numpy as jnp
from jax.experimental import pallas as pl
from jax.experimental.pallas import tpu as pltpu

NEG_INF = float("-inf")
LANES = 128


# ----------------------------- Pallas kernel -------------------------------
def _mask_kernel(valid_ids_ref, valid_scores_ref, out_ref):
    """Writes one (1, S, 128) vocab slab of one batch row.

    valid_ids_ref    : (B, K) int32 in SMEM, padded with -1 (never matches).
    valid_scores_ref : (B, K) f32 in SMEM, scores gathered at valid_ids
                       (values at padded entries are never selected).
    out_ref          : (1, S, 128) VMEM block.
    out[b, v] = scores[b, v] if v in valid[b] else -inf.
    """
    b = pl.program_id(0)
    j = pl.program_id(1)
    _, S, L = out_ref.shape
    K = valid_ids_ref.shape[1]
    tile_elems = S * L
    tile_base = j * tile_elems

    # Scalar gate (scalar unit only): does any valid id land in this slab?
    local_ids = []
    hit = None
    for k in range(K):
        loc = valid_ids_ref[b, k] - tile_base          # slab-local id
        local_ids.append(loc)
        in_tile = jnp.logical_and(loc >= 0, loc < tile_elems)
        hit = in_tile if hit is None else jnp.logical_or(hit, in_tile)

    neg_inf = jnp.asarray(NEG_INF, dtype=out_ref.dtype)

    @pl.when(jnp.logical_not(hit))
    def _():
        # Common case: pure -inf fill, store-only, no VPU compare chain.
        out_ref[...] = jnp.full(out_ref.shape, neg_inf, dtype=out_ref.dtype)

    @pl.when(hit)
    def _():
        sub = jax.lax.broadcasted_iota(jnp.int32, out_ref.shape, 1)
        lane = jax.lax.broadcasted_iota(jnp.int32, out_ref.shape, 2)
        local_id = sub * L + lane
        acc = jnp.full(out_ref.shape, jnp.float32(NEG_INF), dtype=jnp.float32)
        for k in range(K):
            sk = valid_scores_ref[b, k]                # f32 scalar splat
            acc = jnp.where(local_id == local_ids[k], sk, acc)
        out_ref[...] = acc.astype(out_ref.dtype)


@functools.partial(jax.jit, static_argnames=("max_sublanes",))
def valid_actions_logits(scores: jax.Array, valid_ids: jax.Array,
                         *, max_sublanes: int = 2048) -> jax.Array:
    """scores: (B, V) f32, valid_ids: (B, K) int32 padded with -1."""
    B, V = scores.shape
    K = valid_ids.shape[1]

    # Gather only the <= K scores that survive the mask (B*K elements), so the
    # kernel never reads the full scores array.  -1 padding is clipped to a
    # harmless in-range index; those entries are never selected in-kernel.
    safe_ids = jnp.clip(valid_ids, 0, V - 1)
    valid_scores = jnp.take_along_axis(scores, safe_ids, axis=1).astype(jnp.float32)

    rows = pl.cdiv(V, LANES)                 # sublane rows of the dense layout
    min_tiles = 2 if B == 1 else 1           # keep both v7x TCs busy at B == 1
    want_tiles = max(min_tiles, pl.cdiv(rows, max_sublanes))
    S = pl.cdiv(rows, want_tiles)
    if S < rows:
        S = min(((S + 7) // 8) * 8, rows)    # dense (8,128) tiles on interior blocks
    num_tiles = pl.cdiv(rows, S)             # ragged final block masked by Pallas

    out3 = pl.pallas_call(
        _mask_kernel,
        out_shape=jax.ShapeDtypeStruct((B, rows, LANES), scores.dtype),
        grid=(B, num_tiles),
        in_specs=[
            pl.BlockSpec(memory_space=pltpu.MemorySpace.SMEM),   # valid_ids
            pl.BlockSpec(memory_space=pltpu.MemorySpace.SMEM),   # valid_scores
        ],
        out_specs=pl.BlockSpec((1, S, LANES), lambda b, j: (b, j, 0)),
        compiler_params=pltpu.CompilerParams(
            dimension_semantics=("parallel", "parallel")),
        cost_estimate=pl.CostEstimate(
            flops=0, transcendentals=0,
            bytes_accessed=B * rows * LANES * scores.dtype.itemsize
                           + 2 * B * K * 4),
    )(valid_ids, valid_scores)

    out = out3.reshape(B, rows * LANES)
    if rows * LANES != V:
        # TODO(synk): V % 128 != 0 lane tail costs one extra slice pass; a 2-D
        # ragged output BlockSpec would remove it but breaks dense (8,128) tiling.
        out = out[:, :V]
    return out


# ------------------------- Host-side glue (trie) ----------------------------
class Trie:
    def __init__(self):
        self.root = {}

    def insert(self, seq):
        node = self.root
        for tok in seq:
            node = node.setdefault(tok, {})

    def get_next(self, prefix):
        node = self.root
        for tok in prefix:
            if tok not in node:
                return []
            node = node[tok]
        return list(node.keys())


def _max_branching(root):
    best = 1
    stack = [root]
    while stack:
        node = stack.pop()
        if node:
            best = max(best, len(node))
            stack.extend(node.values())
    return best


class ValidActionsLogitsProcessorPallas:
    """Mirrors ValidActionsLogitsProcessor.forward; the mask runs in Pallas."""

    def __init__(self, encoded_choices, eos_token_id):
        self.eos = eos_token_id
        self.tree = Trie()
        self.start_idx = None
        for choice in encoded_choices:
            self.tree.insert(list(choice) + [self.eos])
        # Size K to the trie's max branching factor: no legal action is ever
        # silently dropped.
        self.max_valid = _max_branching(self.tree.root)

    def __call__(self, input_ids, scores):
        # input_ids: (B, T) host-side ints; scores: (B, V) jax array.
        if self.start_idx is None:
            self.start_idx = input_ids.shape[-1]
        decoded_so_far = np.asarray(input_ids)[:, self.start_idx:]

        B = decoded_so_far.shape[0]
        V = scores.shape[-1]
        # TODO(synk): trie traversal is data-dependent host-side dict logic;
        # it has no clean Pallas equivalent and stays in Python.
        valid_ids = np.full((B, self.max_valid), -1, dtype=np.int32)
        for b in range(B):
            nxt = self.tree.get_next([int(t) for t in decoded_so_far[b]])
            if len(nxt) == 0:
                nxt = [self.eos]
            assert len(nxt) <= self.max_valid, "trie branching exceeds K"
            assert all(0 <= t < V for t in nxt), "valid token id out of vocab range"
            valid_ids[b, : len(nxt)] = nxt
        valid_ids = jnp.asarray(valid_ids)  # (B, K) int32, padded with -1

        return valid_actions_logits(scores, valid_ids)

    def reset(self):
        self.start_idx = None


# ------------------------------- Demo / test --------------------------------
if __name__ == "__main__":
    key = jax.random.PRNGKey(0)

    B = 2          # batch
    V = 256        # vocab size
    T0 = 4         # prompt length
    EOS = 0

    # Deterministic synthetic "tokenizer": each choice -> fixed token id list.
    choices = ["move", "smelt", "craft"]
    encoded_choices = [
        [(7 + 13 * i + 3 * j) % (V - 1) + 1 for j, _ in enumerate(ch)]
        for i, ch in enumerate(choices)
    ]

    processor = ValidActionsLogitsProcessorPallas(encoded_choices, EOS)

    # Prompt of length T0 for both batch rows.
    prompt = np.arange(1, T0 + 1, dtype=np.int32)[None, :].repeat(B, axis=0)

    # First call fixes start_idx (== prompt length).
    scores0 = jax.random.normal(key, (B, V), dtype=jnp.float32)
    out0 = jax.block_until_ready(processor(prompt, scores0))

    # Second call: batch 0 decoded first token of choice 0, batch 1 of choice 1.
    gen = np.array([[encoded_choices[0][0]], [encoded_choices[1][0]]], dtype=np.int32)
    input_ids = np.concatenate([prompt, gen], axis=1)
    key, sub = jax.random.split(key)
    scores1 = jax.random.normal(sub, (B, V), dtype=jnp.float32)
    out1 = jax.block_until_ready(processor(input_ids, scores1))

    # Reference check (numpy) for both calls (finite logits: where == add).
    def reference(proc, ids, sc):
        dec = np.asarray(ids)[:, proc.start_idx:]
        ref = np.full(sc.shape, -np.inf, dtype=np.float32)
        for b in range(sc.shape[0]):
            nxt = proc.tree.get_next([int(t) for t in dec[b]])
            if len(nxt) == 0:
                nxt = [proc.eos]
            for t in nxt:
                ref[b, t] = 0.0
        return np.asarray(sc) + ref

    np.testing.assert_allclose(np.asarray(out0), reference(processor, prompt, scores0),
                               rtol=1e-6, atol=1e-6)
    np.testing.assert_allclose(np.asarray(out1), reference(processor, input_ids, scores1),
                               rtol=1e-6, atol=1e-6)

    # Extra check: vocab not a multiple of 128 (exercises the lane-tail slice).
    V2, K2 = 1000, 8
    key, s1, s2 = jax.random.split(key, 3)
    scores2 = jax.random.normal(s1, (B, V2), dtype=jnp.float32)
    vids = np.full((B, K2), -1, dtype=np.int32)
    vids[:, :3] = np.asarray(jax.random.randint(s2, (B, 3), 0, V2))
    out2 = jax.block_until_ready(valid_actions_logits(scores2, jnp.asarray(vids)))
    ref2 = np.full((B, V2), -np.inf, dtype=np.float32)
    for b in range(B):
        for t in vids[b]:
            if t >= 0:
                ref2[b, t] = np.asarray(scores2)[b, t]
    np.testing.assert_allclose(np.asarray(out2), ref2, rtol=1e-6, atol=1e-6)

    # Extra check: B=1 decode-style case -> two vocab tiles (megacore split),
    # partial final row block, and ragged lane tail, all at once.
    B1, V3, K3 = 1, 1900, 6
    key, s3, s4 = jax.random.split(key, 3)
    scores3 = jax.random.normal(s3, (B1, V3), dtype=jnp.float32)
    vids3 = np.full((B1, K3), -1, dtype=np.int32)
    vids3[0, :4] = np.asarray(jax.random.randint(s4, (4,), 0, V3))
    out3 = jax.block_until_ready(valid_actions_logits(scores3, jnp.asarray(vids3)))
    ref3 = np.full((B1, V3), -np.inf, dtype=np.float32)
    for t in vids3[0]:
        if t >= 0:
            ref3[0, t] = np.asarray(scores3)[0, t]
    np.testing.assert_allclose(np.asarray(out3), ref3, rtol=1e-6, atol=1e-6)

    print("KERNEL_OK")
</pallas_src>

<mosaic_0001>
module attributes {stable_mosaic.version = 11 : i64} {
  func.func @_mask_kernel(%arg0: i32, %arg1: i32, %arg2: memref<2x3xi32, #tpu.memory_space<smem>>, %arg3: memref<2x3xf32, #tpu.memory_space<smem>>, %arg4: memref<1x2x128xf32, #tpu.memory_space<vmem>>) attributes {dimension_semantics = [#tpu.dimension_semantics<parallel>, #tpu.dimension_semantics<parallel>], iteration_bounds = array<i64: 2, 1>, scalar_prefetch = 0 : i64, scratch_operands = 0 : i64, tpu.core_type = #tpu.core_type<tc>, window_params = [{transform_indices = @transform_0, window_bounds = array<i64: 2, 3>}, {transform_indices = @transform_1, window_bounds = array<i64: 2, 3>}, {transform_indices = @transform_2, window_bounds = array<i64: 1, 2, 128>}]} {
    %c256_i32 = arith.constant 256 : i32
    %0 = arith.muli %arg1, %c256_i32 : i32
    %1 = arith.index_cast %arg0 : i32 to index
    %c0 = arith.constant 0 : index
    %2 = memref.load %arg2[%1, %c0] : memref<2x3xi32, #tpu.memory_space<smem>>
    %3 = arith.subi %2, %0 : i32
    %c0_i32 = arith.constant 0 : i32
    %4 = arith.cmpi sge, %3, %c0_i32 : i32
    %c256_i32_0 = arith.constant 256 : i32
    %5 = arith.cmpi slt, %3, %c256_i32_0 : i32
    %6 = arith.andi %4, %5 : i1
    %7 = arith.index_cast %arg0 : i32 to index
    %c1 = arith.constant 1 : index
    %8 = memref.load %arg2[%7, %c1] : memref<2x3xi32, #tpu.memory_space<smem>>
    %9 = arith.subi %8, %0 : i32
    %c0_i32_1 = arith.constant 0 : i32
    %10 = arith.cmpi sge, %9, %c0_i32_1 : i32
    %c256_i32_2 = arith.constant 256 : i32
    %11 = arith.cmpi slt, %9, %c256_i32_2 : i32
    %12 = arith.andi %10, %11 : i1
    %13 = arith.ori %6, %12 : i1
    %14 = arith.index_cast %arg0 : i32 to index
    %c2 = arith.constant 2 : index
    %15 = memref.load %arg2[%14, %c2] : memref<2x3xi32, #tpu.memory_space<smem>>
    %16 = arith.subi %15, %0 : i32
    %c0_i32_3 = arith.constant 0 : i32
    %17 = arith.cmpi sge, %16, %c0_i32_3 : i32
    %c256_i32_4 = arith.constant 256 : i32
    %18 = arith.cmpi slt, %16, %c256_i32_4 : i32
    %19 = arith.andi %17, %18 : i1
    %20 = arith.ori %13, %19 : i1
    %true = arith.constant true
    %21 = arith.xori %20, %true : i1
    %22 = arith.extui %21 : i1 to i32
    %cst = arith.constant 0xFF800000 : f32
    %c0_i32_5 = arith.constant 0 : i32
    %23 = arith.cmpi ne, %22, %c0_i32_5 : i32
    scf.if %23 {
      %26 = vector.broadcast %cst : f32 to vector<1x2x128xf32>
      %c0_7 = arith.constant 0 : index
      %c0_8 = arith.constant 0 : index
      %c0_9 = arith.constant 0 : index
      %27 = vector.load %arg4[%c0_7, %c0_8, %c0_9] : memref<1x2x128xf32, #tpu.memory_space<vmem>>, vector<1x2x128xf32>
      tpu.vector_store %arg4[%c0_7, %c0_8, %c0_9], %26 {strides = array<i32>} : memref<1x2x128xf32, #tpu.memory_space<vmem>>, vector<1x2x128xf32>,
    } else {
    }
    %24 = arith.extui %20 : i1 to i32
    %c0_i32_6 = arith.constant 0 : i32
    %25 = arith.cmpi ne, %24, %c0_i32_6 : i32
    scf.if %25 {
      %26 = tpu.iota {dimensions = array<i32: 1>} : vector<1x2x128xi32>
      %27 = tpu.iota {dimensions = array<i32: 2>} : vector<1x2x128xi32>
      %c128_i32 = arith.constant 128 : i32
      %28 = vector.broadcast %c128_i32 : i32 to vector<1x2x128xi32>
      %29 = arith.muli %26, %28 : vector<1x2x128xi32>
      %30 = arith.addi %29, %27 : vector<1x2x128xi32>
      %cst_7 = arith.constant 0xFF800000 : f32
      %31 = vector.broadcast %cst_7 : f32 to vector<1x2x128xf32>
      %32 = arith.index_cast %arg0 : i32 to index
      %c0_8 = arith.constant 0 : index
      %33 = memref.load %arg3[%32, %c0_8] : memref<2x3xf32, #tpu.memory_space<smem>>
      %34 = vector.broadcast %3 : i32 to vector<1x2x128xi32>
      %35 = arith.cmpi eq, %30, %34 : vector<1x2x128xi32>
      %36 = vector.broadcast %33 : f32 to vector<1x2x128xf32>
      %37 = arith.select %35, %36, %31 : vector<1x2x128xi1>, vector<1x2x128xf32>
      %38 = arith.index_cast %arg0 : i32 to index
      %c1_9 = arith.constant 1 : index
      %39 = memref.load %arg3[%38, %c1_9] : memref<2x3xf32, #tpu.memory_space<smem>>
      %40 = vector.broadcast %9 : i32 to vector<1x2x128xi32>
      %41 = arith.cmpi eq, %30, %40 : vector<1x2x128xi32>
      %42 = vector.broadcast %39 : f32 to vector<1x2x128xf32>
      %43 = arith.select %41, %42, %37 : vector<1x2x128xi1>, vector<1x2x128xf32>
      %44 = arith.index_cast %arg0 : i32 to index
      %c2_10 = arith.constant 2 : index
      %45 = memref.load %arg3[%44, %c2_10] : memref<2x3xf32, #tpu.memory_space<smem>>
      %46 = vector.broadcast %16 : i32 to vector<1x2x128xi32>
      %47 = arith.cmpi eq, %30, %46 : vector<1x2x128xi32>
      %48 = vector.broadcast %45 : f32 to vector<1x2x128xf32>
      %49 = arith.select %47, %48, %43 : vector<1x2x128xi1>, vector<1x2x128xf32>
      %c0_11 = arith.constant 0 : index
      %c0_12 = arith.constant 0 : index
      %c0_13 = arith.constant 0 : index
      %50 = vector.load %arg4[%c0_11, %c0_12, %c0_13] : memref<1x2x128xf32, #tpu.memory_space<vmem>>, vector<1x2x128xf32>
      tpu.vector_store %arg4[%c0_11, %c0_12, %c0_13], %49 {strides = array<i32>} : memref<1x2x128xf32, #tpu.memory_space<vmem>>, vector<1x2x128xf32>,
    } else {
    }
    return
  }
  func.func @transform_0(%arg0: i32, %arg1: i32) -> (i32, i32) {
    %c0_i32 = arith.constant 0 : i32
    %c0_i32_0 = arith.constant 0 : i32
    %c0_i32_1 = arith.constant 0 : i32
    return %c0_i32, %c0_i32_0 : i32, i32
  }
  func.func @transform_1(%arg0: i32, %arg1: i32) -> (i32, i32) {
    %c0_i32 = arith.constant 0 : i32
    %c0_i32_0 = arith.constant 0 : i32
    %c0_i32_1 = arith.constant 0 : i32
    return %c0_i32, %c0_i32_0 : i32, i32
  }
  func.func @transform_2(%arg0: i32, %arg1: i32) -> (i32, i32, i32) {
    %c0_i32 = arith.constant 0 : i32
    %c0_i32_0 = arith.constant 0 : i32
    return %arg0, %arg1, %c0_i32 : i32, i32, i32
  }
}

</mosaic_0001>

<bundles_post_ra>
// kernel: valid_actions_logits.1
= control target key start
LH: loop header
LB: loop body
LE: loop exit
PB: predicated region body
PF: predicated region fallthrough
CT: control target
= control target key end

     0   :  { %7 = vsyncpa [#allocation3], 0  ;;  %s531_s0 = inlined_call_operand.vmem [shape: s32[2,3], index: 0, kind: input, shape index: {}]   ;;  %s532_s1 = inlined_call_operand.vmem [shape: f32[2,3], index: 1, kind: input, shape index: {}]   ;;  %s533_s2 = inlined_call_operand.vmem [shape: f32[2,2,128], index: 2, kind: output, shape index: {}]  }
   0x1   :  { %8 = vsyncpa [#allocation5], 0  ;;  %s442_s9 = smov 0   ;;  %s444_s10 = smov 0  }
   0x2   :  { %s446_s11 = smov 0  }
   0x3 LB: > { %s304_s12 = sadd.s32 4294967295, %s422_s11   ;;  %s26_s13 = sadd.s32 1, %s418_s10  ;;  %s422_s11 = sphi %s446_s11, %s14_s11   ;;  %s418_s10 = sphi %s444_s10, %s537_s10   ;;  %s414_s9 = sphi %s442_s9, %s536_s9  }
   0x4   : > { %p28_p0 = scmp.ge.s32.totalorder %s26_s13, 2  ;;  %p306_p1 = scmp.ge.s32.totalorder %s422_s11, 1 }
   0x5   : > { %p101_p2 = scmp.lt.s32.totalorder %s422_s11, 3  ;;  %p463_p4 = scmp.eq.s32.totalorder %s304_s12, 0 }
   0x6   : > { %s539_s13 = smov (%p28_p0, %s26_s13), 0  ;;  %s113_s17 = sshll.u32 %s531_s0, 4  ;;  %s114_s17 = int_to_ptr.vmem [resolvable:$true] %s113_s17 }
   0x7   : > { %p102_p3 = pnand %p306_p1, %p101_p2  ;;  %s123_s20 = sshll.u32 %s532_s1, 4  ;;  %s124_s20 = int_to_ptr.vmem [resolvable:$true] %s123_s20 }
   0x8   : > { %s424_s21 = smov [#allocation2]   ;;  %s425_s22 = smov [#allocation4]  }
   0x9   : > { %p324_p5 = pneg %p102_p3 }
   0xa   : > { %136 = sbr.rel (%p102_p3) target bundleno = 58 (0x3a), region = 28 }
   0xb   : > { %p325_p6 = pnand %p463_p4, %p324_p5 }
   0xd   : > { %327 = dma.vmem_to_smem (!%p325_p6), %s114_s17, 32, %s424_s21, [#allocation3]  }
   0xe   : > { %330 = dma.vmem_to_smem (!%p325_p6), %s124_s20, 32, %s425_s22, [#allocation5]  }
   0xf   : > { %405 = dma.done.wait (%p463_p4), [#allocation3], 32  }
  0x10   : > { %407 = vsyncadd (%p463_p4), [#allocation3], 4294967264 }
  0x11   : > { %409 = dma.done.wait (%p463_p4), [#allocation5], 32  }
  0x12   : > { %411 = vsyncadd (%p463_p4), [#allocation5], 4294967264 }
  0x13   : > { %148 = sfence }
  0x14   : > { %p162_p7 = scmp.lt.s32.totalorder %s414_s9, 1  ;;  %s485_s23 = sshll.u32 %s414_s9, 7 }
  0x15   : > { %s488_s24 = sld [smem:[#allocation2 + %s485_s23]]  ;;  %s177_s25 = sadd.s32 1, %s485_s23 }
  0x16   : > { %s541_s9 = smov (!%p162_p7, %s414_s9), 1  ;;  %s492_s26 = sld [smem:[#allocation2 + %s177_s25]] }
  0x17   : > { %s185_s27 = sadd.s32 2, %s485_s23  ;;  %s312_s28 = sshll.u32 %s541_s9, 1 }
  0x18   : > { %s495_s29 = sld [smem:[#allocation2 + %s185_s27]]  ;;  %s500_s4 = scalar_lea.vmem %s533_s2, %s312_s28 }
  0x1b   : > { %p173_p8 = scmp.ge.s32.totalorder %s488_s24, 0  ;;  %p174_p9 = scmp.lt.s32.totalorder %s488_s24, 256 }
  0x1c   : > { %p180_p11 = scmp.ge.s32.totalorder %s492_s26, 0  ;;  %p181_p12 = scmp.lt.s32.totalorder %s492_s26, 256 }
  0x1d   : > { %p175_p10 = pnand %p174_p9, %p173_p8 }
  0x1e   : > { %p188_p13 = scmp.ge.s32.totalorder %s495_s29, 0  ;;  %p189_p0 = scmp.lt.s32.totalorder %s495_s29, 256 }
  0x1f   : > { %p176_p1 = pneg %p175_p10  ;;  %p182_p2 = pnand %p181_p12, %p180_p11 }
  0x20   : > { %p190_p3 = pnand %p189_p0, %p188_p13 }
  0x21   : > { %p183_p4 = pneg %p182_p2 }
  0x22   : > { %p191_p5 = pneg %p190_p3 }
  0x23   : > { %p184_p6 = por %p183_p4, %p176_p1 }
  0x25   : > { %p508_p7 = por %p191_p5, %p184_p6 }
  0x26   : > { %v196_v0 = vlaneseq (%p508_p7)  ;;  %s202_s6 = sld [smem:[#allocation4 + %s485_s23]] (%p508_p7)  ;;  %v203_v4 = vstv (%p508_p7), %s488_s24  ;;  %v208_v5 = vstv (%p508_p7), %s492_s26  ;;  %v213_v6 = vstv (%p508_p7), %s495_s29 }
  0x27   : > { %195 = sbr.rel (!%p508_p7) target bundleno = 51 (0x33), region = 40  ;;  %s207_s7 = sld [smem:[#allocation4 + %s177_s25]] (%p508_p7) }
  0x28   : > { %v197_v1 = vshrl.u32 (%p508_p7), %v196_v0, 7  ;;  %v199_v2 = vand.u32 (%p508_p7), 127, %v196_v0  ;;  %s212_s8 = sld [smem:[#allocation4 + %s185_s27]] (%p508_p7) }
  0x2a   : > { %v200_v3 = vmul.u32 (%p508_p7), 128, %v197_v1 }
  0x2c   : > { %v201_v7 = vadd.s32 %v200_v3, %v199_v2  ;;  %v205_v8 = vstv %s202_s6 }
  0x2d   : > { %v210_v9 = vstv %s207_s7 }
  0x2e   : > { %vm204_vm0 = vcmp.eq.s32.totalorder %v201_v7, %v203_v4  ;;  %vm209_vm1 = vcmp.eq.s32.totalorder %v201_v7, %v208_v5  ;;  %vm214_vm2 = vcmp.eq.s32.totalorder %v201_v7, %v213_v6  ;;  %v215_v10 = vstv %s212_s8 }
  0x2f   : > { %v206_v11 = vsel %vm204_vm0, %v205_v8, -inf }
  0x30   : > { %v211_v12 = vsel %vm209_vm1, %v210_v9, %v206_v11 }
  0x31   : > { %v216_v13 = vsel %vm214_vm2, %v215_v10, %v211_v12 }
  0x32   : > { %217 = vst [vmem:[%s500_s4] sm:$0x3] %v216_v13 }
  0x33 PF: > { %220 = sbr.rel (%p508_p7) target bundleno = 58 (0x3a), region = 44 }
  0x38   : > { %v426_v14 = vmov -inf  }
  0x39   : > { %221 = vst [vmem:[%s500_s4] sm:$0x3] %v426_v14 }
  0x3a PF: > { %s14_s11 = sadd.s32 1, %s422_s11   ;;  %s536_s9 = smov %s418_s10 }
  0x3b   : > { %p11_p8 = scmp.ge.s32.totalorder %s14_s11, 4   ;;  %s537_s10 = smov %s539_s13 }
  0x3d   :  { %13 = sbr.rel (!%p11_p8) target bundleno = 3 (0x3), region = 72 }
  0x42   :  { %247 = vsyncpa [#allocation3], 1 }
  0x43   :  { %249 = vsyncpa [#allocation3 + $0x1], 1 }
  0x44   :  { %250 = vsyncpa [#allocation5], 1 }

</bundles_post_ra>
